<compile_context>
chip_gen: v6e
topology: v6e:2x2x1
jax: 0.10.0
libtpu: 0.0.40
codegen_flags: <defaults>
</compile_context>

<pallas_src>
import functools

import jax
import jax.numpy as jnp
import numpy as np
from jax.experimental import pallas as pl
from jax.experimental.pallas import tpu as pltpu

_SUBLANES = 8
_LANES = 128
_VMEM_STREAM_BUDGET = 20 * 1024 * 1024   # bytes of double-buffered input blocks
_VMEM_LIMIT = 32 * 1024 * 1024


def _round_up(x, m):
    return ((x + m - 1) // m) * m


def _f1_nomask_kernel(pred_ref, flow_ref, num_ref, *, threshold, valid_rows,
                      block_rows, need_valid):
    # pred/flow: (C, block_rows, W); num out: (1, W) lane-dense partial.
    pred = pred_ref[...].astype(jnp.float32)
    flow = flow_ref[...].astype(jnp.float32)

    diff = pred - flow
    err = jnp.sqrt(jnp.sum(diff * diff, axis=0))           # (block_rows, W)
    flow_len = jnp.sqrt(jnp.sum(flow * flow, axis=0))      # (block_rows, W)
    # err / (flow_len + eps) <= th   <=>   err <= th * (flow_len + eps)
    good = (err <= threshold * (flow_len + 1e-20)).astype(jnp.float32)

    if need_valid:
        # Zero rows that only exist because the last row-block overhangs H.
        r0 = pl.program_id(1) * block_rows
        rows = jax.lax.broadcasted_iota(jnp.int32, good.shape, 0) + r0
        good = jnp.where(rows < valid_rows, good, 0.0)

    num_ref[...] = jnp.sum(good, axis=0, keepdims=True)


def _f1_masked_kernel(pred_ref, flow_ref, mask_ref, num_ref, den_ref, *,
                      threshold, valid_rows, block_rows, need_valid):
    # pred/flow: (C, block_rows, W); mask: (block_rows, W); outs: (1, W).
    pred = pred_ref[...].astype(jnp.float32)
    flow = flow_ref[...].astype(jnp.float32)
    msk = mask_ref[...].astype(jnp.float32)

    diff = pred - flow
    err = jnp.sqrt(jnp.sum(diff * diff, axis=0))
    flow_len = jnp.sqrt(jnp.sum(flow * flow, axis=0))
    good = (err <= threshold * (flow_len + 1e-20)).astype(jnp.float32)

    if need_valid:
        r0 = pl.program_id(1) * block_rows
        rows = jax.lax.broadcasted_iota(jnp.int32, msk.shape, 0) + r0
        valid = rows < valid_rows
        good = jnp.where(valid, good, 0.0)
        msk = jnp.where(valid, msk, 0.0)

    num_ref[...] = jnp.sum(good * msk, axis=0, keepdims=True)
    den_ref[...] = jnp.sum(msk, axis=0, keepdims=True)


def f1_score(flow_pred, flow, threshold, mask=None, *, block_rows=None):
    """Pallas equivalent of F1Score.forward.

    flow_pred, flow: (N, C, H, W) arrays (any float dtype).
    mask: optional (N, H, W) or (N, 1, H, W) array (treated as 0/1 weights).
    Returns a scalar float32.
    """
    assert flow.ndim == 4 and flow_pred.shape == flow.shape
    N, C, H, W = flow.shape

    if mask is not None:
        mask = mask.reshape(N, H, W)
        if not jnp.issubdtype(mask.dtype, jnp.floating):
            mask = mask.astype(jnp.float32)

    # ---- choose the row-block size: biggest that fits the VMEM budget. ----
    w_lanes = _round_up(W, _LANES)
    bytes_per_row = w_lanes * (
        C * (jnp.dtype(flow_pred.dtype).itemsize + jnp.dtype(flow.dtype).itemsize)
        + (jnp.dtype(mask.dtype).itemsize if mask is not None else 0))
    cap = max(_SUBLANES,
              ((_VMEM_STREAM_BUDGET // (2 * bytes_per_row)) // _SUBLANES) * _SUBLANES)
    if block_rows is None:
        br = cap
    else:
        br = min(max(_SUBLANES, _round_up(block_rows, _SUBLANES)), cap)
    br = min(br, _round_up(H, _SUBLANES))

    T = -(-H // br)
    need_valid = (T * br != H)
    grid = (N, T)

    io_spec = pl.BlockSpec((None, C, br, W), lambda n, t: (n, 0, t, 0))
    part_spec = pl.BlockSpec((None, None, 1, W), lambda n, t: (n, t, 0, 0))
    part_shape = jax.ShapeDtypeStruct((N, T, 1, W), jnp.float32)
    cparams = pltpu.CompilerParams(
        dimension_semantics=("parallel", "parallel"),
        vmem_limit_bytes=_VMEM_LIMIT)

    if mask is None:
        num_parts = pl.pallas_call(
            functools.partial(_f1_nomask_kernel, threshold=float(threshold),
                              valid_rows=H, block_rows=br, need_valid=need_valid),
            out_shape=part_shape,
            grid_spec=pltpu.PrefetchScalarGridSpec(
                num_scalar_prefetch=0,
                grid=grid,
                in_specs=[io_spec, io_spec],
                out_specs=part_spec),
            compiler_params=cparams,
        )(flow_pred, flow)
        # torch.mean over all N*H*W positions.
        return jnp.sum(num_parts) / jnp.float32(N * H * W)

    mask_spec = pl.BlockSpec((None, br, W), lambda n, t: (n, t, 0))
    num_parts, den_parts = pl.pallas_call(
        functools.partial(_f1_masked_kernel, threshold=float(threshold),
                          valid_rows=H, block_rows=br, need_valid=need_valid),
        out_shape=(part_shape, part_shape),
        grid_spec=pltpu.PrefetchScalarGridSpec(
            num_scalar_prefetch=0,
            grid=grid,
            in_specs=[io_spec, io_spec, mask_spec],
            out_specs=(part_spec, part_spec)),
        compiler_params=cparams,
    )(flow_pred, flow, mask)
    # sum(f1 * mask) / (sum(mask) + 1e-20)
    return jnp.sum(num_parts) / (jnp.sum(den_parts) + 1e-20)


class F1Score:
    """Functional equivalent of the PyTorch F1Score module (dict inputs OK)."""

    def __init__(self, threshold):
        self.th = float(threshold)

    def __call__(self, output, target, mask=None):
        flow_pred = output["flow"] if isinstance(output, dict) else output
        flow = target["flow"] if isinstance(target, dict) else target
        return f1_score(flow_pred, flow, self.th, mask=mask)


def _f1_reference(flow_pred, flow, threshold, mask=None):
    err = jnp.sqrt(jnp.sum((flow_pred - flow) ** 2, axis=1))
    flow_len = jnp.sqrt(jnp.sum(flow ** 2, axis=1))
    good = (err / (flow_len + 1e-20) <= threshold).astype(jnp.float32)
    if mask is None:
        return jnp.mean(good)
    m = mask.reshape(good.shape).astype(jnp.float32)
    return jnp.sum(good * m) / (jnp.sum(m) + 1e-20)


if __name__ == "__main__":
    key = jax.random.PRNGKey(0)
    k1, k2, k3 = jax.random.split(key, 3)
    threshold = 0.5

    def check(pred, flw, msk=None, **kw):
        out = f1_score(pred, flw, threshold, mask=msk, **kw)
        jax.block_until_ready(out)
        ref = _f1_reference(pred, flw, threshold, mask=msk)
        assert np.allclose(np.asarray(out), np.asarray(ref), atol=1e-5), (out, ref)
        return ref

    # Flow fields: 2 channels (u, v).
    N, C, H, W = 2, 2, 16, 16
    flow = jax.random.normal(k1, (N, C, H, W), dtype=jnp.float32)
    flow_pred = flow + 0.3 * jax.random.normal(k2, (N, C, H, W), dtype=jnp.float32)
    mask = (jax.random.uniform(k3, (N, H, W)) > 0.3).astype(jnp.float32)

    check(flow_pred, flow)                 # mean over all pixels
    ref_m = check(flow_pred, flow, mask)   # masked ratio

    # Module-style call with dict inputs (matches the PyTorch forward signature).
    metric = F1Score(threshold)
    out_d = metric({"flow": flow_pred}, {"flow": flow}, mask=mask)
    jax.block_until_ready(out_d)
    assert np.allclose(np.asarray(out_d), np.asarray(ref_m), atol=1e-5), (out_d, ref_m)

    # Odd tiny spatial size: exercises row-block overhang + sub-128 lane width.
    H2, W2 = 5, 7
    flow_b = jax.random.normal(k1, (N, C, H2, W2), dtype=jnp.float32)
    pred_b = flow_b + 0.3 * jax.random.normal(k2, (N, C, H2, W2), dtype=jnp.float32)
    mask_b = (jax.random.uniform(k3, (N, H2, W2)) > 0.3).astype(jnp.float32)
    check(pred_b, flow_b)
    check(pred_b, flow_b, mask_b)

    # Multi-tile grid with overhang and W > 128 (not a multiple of 128).
    H3, W3 = 50, 160
    flow_c = jax.random.normal(k1, (N, C, H3, W3), dtype=jnp.float32)
    pred_c = flow_c + 0.3 * jax.random.normal(k2, (N, C, H3, W3), dtype=jnp.float32)
    mask_c = (jax.random.uniform(k3, (N, H3, W3)) > 0.3).astype(jnp.float32)
    check(pred_c, flow_c, block_rows=16)
    check(pred_c, flow_c, mask_c, block_rows=16)

    print("KERNEL_OK")
</pallas_src>

<mosaic_0001>
module attributes {stable_mosaic.version = 11 : i64} {
  func.func @_f1_nomask_kernel(%arg0: i32, %arg1: i32, %arg2: memref<1x2x16x16xf32, #tpu.memory_space<vmem>>, %arg3: memref<1x2x16x16xf32, #tpu.memory_space<vmem>>, %arg4: memref<1x1x1x16xf32, #tpu.memory_space<vmem>>) attributes {dimension_semantics = [#tpu.dimension_semantics<parallel>, #tpu.dimension_semantics<parallel>], iteration_bounds = array<i64: 2, 1>, scalar_prefetch = 0 : i64, scratch_operands = 0 : i64, tpu.core_type = #tpu.core_type<tc>, window_params = [{transform_indices = @transform_0, window_bounds = array<i64: 1, 2, 16, 16>}, {transform_indices = @transform_1, window_bounds = array<i64: 1, 2, 16, 16>}, {transform_indices = @transform_2, window_bounds = array<i64: 1, 1, 1, 16>}]} {
    %c0 = arith.constant 0 : index
    %c0_0 = arith.constant 0 : index
    %c0_1 = arith.constant 0 : index
    %c0_2 = arith.constant 0 : index
    %0 = vector.load %arg2[%c0, %c0_0, %c0_1, %c0_2] : memref<1x2x16x16xf32, #tpu.memory_space<vmem>>, vector<1x2x16x16xf32>
    %1 = vector.shape_cast %0 : vector<1x2x16x16xf32> to vector<2x16x16xf32>
    %c0_3 = arith.constant 0 : index
    %c0_4 = arith.constant 0 : index
    %c0_5 = arith.constant 0 : index
    %c0_6 = arith.constant 0 : index
    %2 = vector.load %arg3[%c0_3, %c0_4, %c0_5, %c0_6] : memref<1x2x16x16xf32, #tpu.memory_space<vmem>>, vector<1x2x16x16xf32>
    %3 = vector.shape_cast %2 : vector<1x2x16x16xf32> to vector<2x16x16xf32>
    %4 = arith.subf %1, %3 : vector<2x16x16xf32>
    %5 = arith.mulf %4, %4 : vector<2x16x16xf32>
    %cst = arith.constant dense<0.000000e+00> : vector<16x16xf32>
    %6 = vector.multi_reduction <add>, %5, %cst [0] : vector<2x16x16xf32> to vector<16x16xf32>
    %7 = math.sqrt %6 : vector<16x16xf32>
    %8 = arith.mulf %3, %3 : vector<2x16x16xf32>
    %cst_7 = arith.constant dense<0.000000e+00> : vector<16x16xf32>
    %9 = vector.multi_reduction <add>, %8, %cst_7 [0] : vector<2x16x16xf32> to vector<16x16xf32>
    %10 = math.sqrt %9 : vector<16x16xf32>
    %cst_8 = arith.constant 9.99999968E-21 : f32
    %11 = vector.broadcast %cst_8 : f32 to vector<16x16xf32>
    %12 = arith.addf %10, %11 : vector<16x16xf32>
    %cst_9 = arith.constant 5.000000e-01 : f32
    %13 = vector.broadcast %cst_9 : f32 to vector<16x16xf32>
    %14 = arith.mulf %13, %12 : vector<16x16xf32>
    %15 = arith.cmpf ole, %7, %14 : vector<16x16xf32>
    %16 = arith.extui %15 : vector<16x16xi1> to vector<16x16xi32>
    %17 = arith.sitofp %16 : vector<16x16xi32> to vector<16x16xf32>
    %cst_10 = arith.constant dense<0.000000e+00> : vector<16xf32>
    %18 = vector.multi_reduction <add>, %17, %cst_10 [0] : vector<16x16xf32> to vector<16xf32>
    %19 = vector.shape_cast %18 : vector<16xf32> to vector<1x16xf32>
    %c0_11 = arith.constant 0 : index
    %c0_12 = arith.constant 0 : index
    %c0_13 = arith.constant 0 : index
    %c0_14 = arith.constant 0 : index
    %20 = vector.load %arg4[%c0_11, %c0_12, %c0_13, %c0_14] : memref<1x1x1x16xf32, #tpu.memory_space<vmem>>, vector<1x1x1x16xf32>
    %21 = vector.shape_cast %20 : vector<1x1x1x16xf32> to vector<1x16xf32>
    %22 = vector.shape_cast %19 : vector<1x16xf32> to vector<1x1x1x16xf32>
    tpu.vector_store %arg4[%c0_11, %c0_12, %c0_13, %c0_14], %22 {strides = array<i32>} : memref<1x1x1x16xf32, #tpu.memory_space<vmem>>, vector<1x1x1x16xf32>,
    return
  }
  func.func @transform_0(%arg0: i32, %arg1: i32) -> (i32, i32, i32, i32) {
    %c0_i32 = arith.constant 0 : i32
    %c0_i32_0 = arith.constant 0 : i32
    %c0_i32_1 = arith.constant 0 : i32
    return %arg0, %c0_i32, %arg1, %c0_i32_0 : i32, i32, i32, i32
  }
  func.func @transform_1(%arg0: i32, %arg1: i32) -> (i32, i32, i32, i32) {
    %c0_i32 = arith.constant 0 : i32
    %c0_i32_0 = arith.constant 0 : i32
    %c0_i32_1 = arith.constant 0 : i32
    return %arg0, %c0_i32, %arg1, %c0_i32_0 : i32, i32, i32, i32
  }
  func.func @transform_2(%arg0: i32, %arg1: i32) -> (i32, i32, i32, i32) {
    %c0_i32 = arith.constant 0 : i32
    %c0_i32_0 = arith.constant 0 : i32
    %c0_i32_1 = arith.constant 0 : i32
    return %arg0, %arg1, %c0_i32, %c0_i32_0 : i32, i32, i32, i32
  }
}

</mosaic_0001>

<bundles_post_ra>
// kernel: tpu_custom_call.1
= control target key start
LH: loop header
LB: loop body
LE: loop exit
PB: predicated region body
PF: predicated region fallthrough
CT: control target
= control target key end

     0   :  { %7 = vsyncpa [#allocation3], 0  ;;  %s868_s0 = inlined_call_operand.hbm [shape: f32[2,2,16,16], index: 0, kind: input, shape index: {}]   ;;  %s869_s1 = inlined_call_operand.hbm [shape: f32[2,2,16,16], index: 1, kind: input, shape index: {}]   ;;  %s870_s2 = inlined_call_operand.hbm [shape: f32[2,1,1,16], index: 2, kind: output, shape index: {}]  }
   0x1   :  { %9 = vsyncpa [#allocation3 + $0x1], 0 }
   0x2   :  { %10 = vsyncpa [#allocation6], 0 }
   0x3   :  { %12 = vsyncpa [#allocation6 + $0x1], 0 }
   0x4   :  { %13 = vsyncpa [#allocation4], 0 }
   0x5   :  { %15 = vsyncpa [#allocation4 + $0x1], 0  ;;  %s686_s9 = smov 0   ;;  %s688_s10 = smov 0  }
   0x6   :  { %s690_s11 = smov 0   ;;  %s692_s12 = smov 0  }
   0x7   :  { %s694_s13 = smov 0   ;;  %s696_s14 = smov 0  }
   0x8 LB: > { %s425_s15 = sadd.s32 4294967295, %s663_s14   ;;  %s426_s16 = sadd.s32 4294967294, %s663_s14   ;;  %s663_s14 = sphi %s696_s14, %s21_s14   ;;  %s659_s13 = sphi %s694_s13, %s882_s13   ;;  %s655_s12 = sphi %s692_s12, %s881_s12   ;;  %s651_s11 = sphi %s690_s11, %s880_s11   ;;  %s647_s10 = sphi %s688_s10, %s879_s10   ;;  %s643_s9 = sphi %s686_s9, %s878_s9  }
   0x9   : > { %s33_s17 = sadd.s32 1, %s659_s13  ;;  %s42_s18 = sadd.s32 1, %s651_s11 }
   0xa   : > { %p35_p0 = scmp.ge.s32.totalorder %s33_s17, 2  ;;  %p49_p1 = scmp.ne.s32.totalorder %s651_s11, %s647_s10 }
   0xb   : > { %p50_p2 = scmp.eq.s32.totalorder %s663_s14, 0  ;;  %p55_p3 = scmp.ne.s32.totalorder %s647_s10, %s643_s9 }
   0xc   : > { %s884_s17 = smov (%p35_p0, %s33_s17), 0  ;;  %p56_p5 = scmp.eq.s32.totalorder %s425_s15, 0 }
   0xd   : > { %p727_p4 = por %p50_p2, %p49_p1  ;;  %s37_s20 = ssub.s32 %s659_s13, %s884_s17 }
   0xe   : > { %p109_p6 = scmp.eq.s32.totalorder %s425_s15, 1  ;;  %p40_p7 = scmp.eq.s32.totalorder %s37_s20, 0 }
   0xf   : > { %p733_p8 = por %p56_p5, %p55_p3  ;;  %p115_p10 = scmp.eq.s32.totalorder %s426_s16, 1 }
  0x10   : > { %p737_p9 = por %p109_p6, %p49_p1  ;;  %p462_p13 = scmp.lt.s32.totalorder %s663_s14, 2 }
  0x11   : > { %s742_s23 = scalar_select %p40_p7, %s651_s11, %s42_s18  }
  0x12   : > { %p744_p11 = por %p115_p10, %p55_p3  ;;  %s751_s25 = sand.u32 1, %s651_s11  }
  0x13   : > { %s429_s26 = sshll.u32 %s751_s25, 5  ;;  %s443_s27 = sshll.u32 %s659_s13, 9 }
  0x14   : > { %s147_s30 = scalar_lea.hbm %s868_s0, %s443_s27  ;;  %s139_s3 = scalar_lea.vmem [#allocation2], %s429_s26 }
  0x15   : > { %s148_s4 = sshll.u32 %s139_s3, 4  ;;  %p764_p0 = pnand %p462_p13, %p727_p4  ;;  %s149_s4 = int_to_ptr.vmem [resolvable:$true] %s148_s4 }
  0x16   : > { %p435_p1 = scmp.ge.s32.totalorder %s663_s14, 1  ;;  %s136_s6 = scalar_lea.sflag [#allocation3], %s751_s25 }
  0x17   : > { %p525_p2 = pneg %p764_p0  ;;  %s536_s7 = scalar_lea.vmem %s149_s4, 512 }
  0x18   : > { %p537_p3 = scmp.ne.s32.totalorder %s149_s4, %s536_s7  ;;  %s665_s8 = smov [#allocation2]  }
  0x19   : > { %s541_s15 = sshll.u32 %s665_s8, 4  ;;  %s542_s15 = int_to_ptr.vmem [resolvable:$false] %s541_s15 }
  0x1a   : > { %p539_p5 = pnand %p537_p3, %p525_p2  ;;  %s543_s16 = scalar_lea.vmem %s542_s15, 1024 }
  0x1b   : > { %p544_p4 = scmp.lt.s32.totalorder %s149_s4, %s542_s15  ;;  %p545_p7 = scmp.lt.s32.totalorder %s543_s16, %s536_s7 }
  0x1c   : > { %p540_p6 = pneg %p539_p5 }
  0x1d   : > { %p546_p10 = por %p545_p7, %p544_p4 }
  0x1f   : > { %p547_p13 = pnand %p546_p10, %p540_p6 }
  0x21   : > { %550 = shalt.err (!%p547_p13)
}
  0x22   : > { %s666_s18 = smov 128   ;;  %s667_s19 = smov 8  }
  0x23   : > { %454 = dma.hbm_to_vmem [thread:$0]  (!%p764_p0), %s147_s30, 512, %s149_s4, %s136_s6, %s666_s18, %s666_s18, %s667_s19  }
  0x24   : > { %p179_p3 = scmp.lt.s32.totalorder %s663_s14, 3  ;;  %s170_s29 = scalar_lea.hbm %s869_s1, %s443_s27 }
  0x25   : > { %s162_s7 = scalar_lea.vmem [#allocation5], %s429_s26  ;;  %s159_s15 = scalar_lea.sflag [#allocation6], %s751_s25 }
  0x26   : > { %p785_p5 = pnand %p435_p1, %p179_p3  ;;  %s171_s8 = sshll.u32 %s162_s7, 4  ;;  %s172_s8 = int_to_ptr.vmem [resolvable:$true] %s171_s8 }
  0x27   : > { %s564_s16 = scalar_lea.vmem %s172_s8, 512  ;;  %s668_s30 = smov [#allocation5]  }
  0x28   : > { %p565_p6 = scmp.ne.s32.totalorder %s172_s8, %s564_s16  ;;  %s569_s4 = sshll.u32 %s668_s30, 4  ;;  %s570_s4 = int_to_ptr.vmem [resolvable:$false] %s569_s4 }
  0x29   : > { %s571_s27 = scalar_lea.vmem %s570_s4, 1024  ;;  %p572_p10 = scmp.lt.s32.totalorder %s172_s8, %s570_s4 }
  0x2a   : > { %p567_p4 = pnand %p565_p6, %p525_p2  ;;  %p573_p1 = scmp.lt.s32.totalorder %s571_s27, %s564_s16 }
  0x2c   : > { %p568_p7 = pneg %p567_p4  ;;  %p574_p13 = por %p573_p1, %p572_p10 }
  0x2e   : > { %p575_p3 = pnand %p574_p13, %p568_p7 }
  0x30   : > { %578 = shalt.err (!%p575_p3)
}
  0x31   : > { %457 = dma.hbm_to_vmem [thread:$0]  (!%p764_p0), %s170_s29, 512, %s172_s8, %s159_s15, %s666_s18, %s666_s18, %s667_s19  }
  0x32   : > { %183 = sbr.rel (%p785_p5) target bundleno = 120 (0x78), region = 28  ;;  %s800_s25 = sand.u32 (!%p785_p5), 1, %s647_s10  }
  0x33   : > { %s436_s26 = sshll.u32 (!%p785_p5), %s800_s25, 5  ;;  %s186_s6 = scalar_lea.sflag (!%p785_p5), [#allocation3], %s800_s25 }
  0x34   : > { %s189_s20 = scalar_lea.vmem (!%p785_p5), [#allocation2], %s436_s26 }
  0x37   : > { %630 = dma.done.wait (%p733_p8), %s186_s6, 512  }
  0x38   : > { %632 = vsyncadd (%p733_p8), %s186_s6, 4294966784  ;;  %s195_s5 = scalar_lea.sflag [#allocation6], %s800_s25  ;;  %s198_s18 = scalar_lea.vmem [#allocation5], %s436_s26 }
  0x39   : > { %634 = dma.done.wait (%p733_p8), %s195_s5, 512  }
  0x3a   : > { %636 = vsyncadd (%p733_p8), %s195_s5, 4294966784  ;;  %v225_v0 = vld [vmem:[%s189_s20] sm:$0xff]  ;;  %v226_v1 = vld [vmem:[%s189_s20 + $0x8] sm:$0xff]  ;;  %vm241_vm0 = vcmask 130048   ;;  %v669_v56 = vmov 0.0   ;;  %s222_s21 = scalar_lea.vmem [#allocation7], %s800_s25 }
  0x3b   : > { %v227_v2 = vld [vmem:[%s189_s20 + $0x10] sm:$0xff]  ;;  %v228_v3 = vld [vmem:[%s189_s20 + $0x18] sm:$0xff]  ;;  %v229_v4 = vld [vmem:[%s198_s18] sm:$0xff]  ;;  %s321_s19 = sshll.u32 %s222_s21, 4  ;;  %s440_s28 = sshll.u32 %s655_s12, 4  ;;  %vm305_vm11 = vcmask 122880   ;;  %s322_s19 = int_to_ptr.vmem [resolvable:$true] %s321_s19 }
  0x3c   : > { %v230_v5 = vld [vmem:[%s198_s18 + $0x8] sm:$0xff]  ;;  %v231_v6 = vld [vmem:[%s198_s18 + $0x10] sm:$0xff]  ;;  %v232_v7 = vld [vmem:[%s198_s18 + $0x18] sm:$0xff]  ;;  %v233_v8 = vsub.f32 %v225_v0, %v229_v4  ;;  %v262_v10 = vmul.f32 %v229_v4, %v229_v4  ;;  %s319_s7 = scalar_lea.hbm %s870_s2, %s440_s28  ;;  %s308_s8 = scalar_lea.sflag [#allocation4], %s800_s25 }
  0x3d   : > { %v234_v9 = vsub.f32 %v226_v1, %v230_v5  ;;  %v263_v11 = vmul.f32 %v230_v5, %v230_v5  ;;  %v235_v12 = vsub.f32 %v227_v2, %v231_v6  ;;  %v236_v13 = vsub.f32 %v228_v3, %v232_v7  ;;  %s579_s15 = scalar_lea.vmem %s322_s19, 16  ;;  %s670_s16 = smov [#allocation7]  }
  0x3e   : > { %v264_v14 = vmul.f32 %v231_v6, %v231_v6  ;;  %v265_v15 = vmul.f32 %v232_v7, %v232_v7  ;;  %v237_v16 = vmul.f32 %v233_v8, %v233_v8  ;;  %v266_v18 = vsel %vm241_vm0, %v262_v10, 0.0  ;;  %p580_p8 = scmp.ne.s32.totalorder %s322_s19, %s579_s15  ;;  %s583_s30 = sshll.u32 %s670_s16, 4  ;;  %s584_s30 = int_to_ptr.vmem [resolvable:$false] %s583_s30 }
  0x3f   : > { %v238_v17 = vmul.f32 %v234_v9, %v234_v9  ;;  %v269_v19 = vsel %vm241_vm0, %v263_v11, 0.0  ;;  %v239_v20 = vmul.f32 %v235_v12, %v235_v12  ;;  %v240_v21 = vmul.f32 %v236_v13, %v236_v13  ;;  %s585_s4 = scalar_lea.vmem %s584_s30, 32  ;;  %p586_p5 = scmp.lt.s32.totalorder %s322_s19, %s584_s30 }
  0x40   : > { %v267_v22 = vsel %vm241_vm0, %v264_v14, 0.0  ;;  %v270_v23 = vsel %vm241_vm0, %v265_v15, 0.0  ;;  %v242_v24 = vsel %vm241_vm0, %v237_v16, 0.0  ;;  %p581_p0 = pnand %p580_p8, %p737_p9  ;;  %p587_p6 = scmp.lt.s32.totalorder %s585_s4, %s579_s15 }
  0x41   : > { %v245_v25 = vsel %vm241_vm0, %v238_v17, 0.0  ;;  %v268_v26 = vadd.f32 %v267_v22, %v266_v18  ;;  %v271_v27 = vadd.f32 %v270_v23, %v269_v19  ;;  %v243_v28 = vsel %vm241_vm0, %v239_v20, 0.0 }
  0x42   : > { %v246_v29 = vsel %vm241_vm0, %v240_v21, 0.0  ;;  %v244_v30 = vadd.f32 %v243_v28, %v242_v24  ;;  %p582_p2 = pneg %p581_p0  ;;  %p588_p4 = por %p587_p6, %p586_p5 }
  0x43   : > { %v247_v31 = vadd.f32 %v246_v29, %v245_v25  ;;  %515 = vrsqrt.f32 %v268_v26  ;;  %vm274_vm1 = vcmp.eq.f32.partialorder %v268_v26, inf  ;;  %vm276_vm2 = vcmp.eq.f32.partialorder %v268_v26, 0.0 }
  0x44   : > { %517 = vrsqrt.f32 %v271_v27  ;;  %v277_v33 = vand.u32 2147483648, %v268_v26  ;;  %vm250_vm3 = vcmp.eq.f32.partialorder %v244_v30, inf  ;;  %vm281_vm4 = vcmp.eq.f32.partialorder %v271_v27, inf  ;;  %p589_p7 = pnand %p588_p4, %p582_p2 }
  0x45   : > { %519 = vrsqrt.f32 %v244_v30  ;;  %v284_v36 = vand.u32 2147483648, %v271_v27  ;;  %vm252_vm5 = vcmp.eq.f32.partialorder %v244_v30, 0.0  ;;  %v253_v38 = vand.u32 2147483648, %v244_v30 }
  0x46   : > { %521 = vrsqrt.f32 %v247_v31  ;;  %vm283_vm6 = vcmp.eq.f32.partialorder %v271_v27, 0.0  ;;  %vm257_vm7 = vcmp.eq.f32.partialorder %v247_v31, inf  ;;  %v260_v42 = vand.u32 2147483648, %v247_v31 }
  0x47   : > { %vm259_vm8 = vcmp.eq.f32.partialorder %v247_v31, 0.0 }
  0x50   : > { %v516_v32 = vpop.eup %515 }
  0x51   : > { %v518_v34 = vpop.eup %517  ;;  %v273_v35 = vmul.f32 %v516_v32, %v268_v26 }
  0x52   : > { %v520_v37 = vpop.eup %519  ;;  %v280_v39 = vmul.f32 %v518_v34, %v271_v27 }
  0x53   : > { %v522_v40 = vpop.eup %521  ;;  %v249_v41 = vmul.f32 %v520_v37, %v244_v30  ;;  %v275_v43 = vsel %vm274_vm1, %v268_v26, %v273_v35 }
  0x54   : > { %v256_v44 = vmul.f32 %v522_v40, %v247_v31  ;;  %v278_v45 = vsel %vm276_vm2, %v277_v33, %v275_v43  ;;  %v282_v46 = vsel %vm281_vm4, %v271_v27, %v280_v39 }
  0x55   : > { %v251_v47 = vsel %vm250_vm3, %v244_v30, %v249_v41  ;;  %v285_v48 = vsel %vm283_vm6, %v284_v36, %v282_v46  ;;  %v286_v49 = vadd.f32 1e-20, %v278_v45 }
  0x56   : > { %v254_v50 = vsel %vm252_vm5, %v253_v38, %v251_v47  ;;  %v258_v51 = vsel %vm257_vm7, %v247_v31, %v256_v44  ;;  %v287_v52 = vadd.f32 1e-20, %v285_v48 }
  0x57   : > { %v261_v53 = vsel %vm259_vm8, %v260_v42, %v258_v51  ;;  %v288_v54 = vmul.f32 0.5, %v286_v49 }
  0x58   : > { %v289_v55 = vmul.f32 0.5, %v287_v52 }
  0x59   : > { %vm290_vm9 = vcmp.le.f32.partialorder %v254_v50, %v288_v54 }
  0x5a   : > { %vm291_vm10 = vcmp.le.f32.partialorder %v261_v53, %v289_v55  ;;  %v438_v57 = vsel %vm290_vm9, 1.0, %v669_v56 }
  0x5b   : > { %v439_v58 = vsel %vm291_vm10, 1.0, %v669_v56  ;;  %v296_v59 = vsel %vm241_vm0, %v438_v57, 0.0 }
  0x5c   : > { %v297_v60 = vsel %vm241_vm0, %v439_v58, 0.0 }
  0x5d   : > { %v298_v61 = vadd.f32 %v297_v60, %v296_v59 }
  0x5f   : > { %v299_v62 = vrot.slane %v298_v61, 4 }
  0x61   : > { %v300_v63 = vadd.f32 %v299_v62, %v298_v61 }
  0x63   : > { %v301_v0 = vrot.slane %v300_v63, 2 }
  0x65   : > { %v302_v1 = vadd.f32 %v301_v0, %v300_v63 }
  0x67   : > { %v303_v2 = vrot.slane %v302_v1, 1 }
  0x69   : > { %v304_v3 = vadd.f32 %v303_v2, %v302_v1 }
  0x6b   : > { %306 = vst.msk [vmem:[%s222_s21] sm:$0x1] %vm305_vm11, %v304_v3 }
  0x6c   : > { %592 = shalt.err (!%p589_p7)
}
  0x6d   : > { %s593_s12 = scalar_lea.hbm %s319_s7, 16  ;;  %s597_s26 = scalar_lea.hbm %s870_s2, 32 }
  0x6e   : > { %p594_p10 = scmp.ne.s32.totalorder %s319_s7, %s593_s12  ;;  %p598_p3 = scmp.lt.s32.totalorder %s319_s7, %s870_s2 }
  0x6f   : > { %p599_p8 = scmp.lt.s32.totalorder %s597_s26, %s593_s12 }
  0x70   : > { %p595_p1 = pnand %p594_p10, %p737_p9 }
  0x71   : > { %p600_p0 = por %p599_p8, %p598_p3 }
  0x72   : > { %p596_p13 = pneg %p595_p1 }
  0x74   : > { %p601_p12 = pnand %p600_p0, %p596_p13 }
  0x76   : > { %604 = shalt.err (!%p601_p12)
}
  0x77   : > { %449 = dma.vmem_to_hbm [thread:$0]  (%p737_p9), %s322_s19, 16, %s319_s7, %s308_s8  }
  0x78 PF: > { %s333_s5 = sand.u32 1, %s643_s9   ;;  %p877_p2 = scmp.ge.s32.totalorder %s663_s14, 2 }
  0x79   : > { %s334_s18 = scalar_lea.sflag [#allocation4], %s333_s5 }
  0x7a   : > { %p459_p5 = pnand %p877_p2, %p744_p11 }
  0x7c   : > { %p460_p6 = pneg %p459_p5 }
  0x7e   : > { %638 = dma.done.wait (%p460_p6), %s334_s18, 16  }
  0x7f   : > { %640 = vsyncadd (%p460_p6), %s334_s18, 4294967280  ;;  %s21_s14 = sadd.s32 1, %s663_s14   ;;  %s878_s9 = smov %s647_s10 }
  0x80   : > { %p18_p4 = scmp.ge.s32.totalorder %s21_s14, 4   ;;  %s879_s10 = smov %s651_s11 }
  0x81   : > { %s880_s11 = smov %s742_s23  ;;  %s881_s12 = smov %s659_s13 }
  0x82   : > { %s882_s13 = smov %s884_s17  ;;  %20 = sbr.rel (!%p18_p4) target bundleno = 8 (0x8), region = 86 }
  0x87   :  { %338 = vsyncpa [#allocation3], 1 }
  0x88   :  { %340 = vsyncpa [#allocation3 + $0x1], 1 }
  0x89   :  { %341 = vsyncpa [#allocation6], 1 }
  0x8a   :  { %343 = vsyncpa [#allocation6 + $0x1], 1 }
  0x8b   :  { %344 = vsyncpa [#allocation4], 1 }
  0x8c   :  { %346 = vsyncpa [#allocation4 + $0x1], 1 }

</bundles_post_ra>
